<compile_context>
chip_gen: v6e
topology: v6e:2x2x1
jax: 0.10.0
libtpu: 0.0.40
codegen_flags: <defaults>
</compile_context>

<pallas_src>
import functools

import jax
import jax.numpy as jnp
from jax.experimental import pallas as pl
from jax.experimental.pallas import tpu as pltpu

_INV_SQRT2 = 0.7071067811865476


def _round_up(x, m):
    return (x + m - 1) // m * m


def _gelu_exact(y):
    # Exact erf GELU, matching torch.nn.GELU() default.
    return 0.5 * y * (1.0 + jax.lax.erf(y * _INV_SQRT2))


def _make_mlp_kernel(n_extra_hidden, features):
    """Fused MLP kernel body.

    Ref order (features=False): x, w0, b0, [wh, bh,] wo, bo, out
    Ref order (features=True) : x, w0, b0, [wh, bh,] feat
      x   : (TILE_B, F)        f32   raw batch tile (feature selection folded into w0)
      w0  : (F, H_p)           bf16  first-layer weight, pre-transposed
      b0  : (1, H_p)           f32
      wh  : (L-1, H_p, H_p)    bf16  remaining hidden weights (absent if num_layers == 1)
      bh  : (L-1, 1, H_p)      f32
      wo  : (H_p, N_p)         bf16  output-head weight (only when features=False)
      bo  : (1, N_p)           f32
    """
    def kernel(*refs):
        idx = 0
        x_ref = refs[idx]; idx += 1
        w0_ref = refs[idx]; idx += 1
        b0_ref = refs[idx]; idx += 1
        wh_ref = bh_ref = None
        if n_extra_hidden > 0:
            wh_ref = refs[idx]; idx += 1
            bh_ref = refs[idx]; idx += 1

        # Layer 0 (activation never leaves VMEM/vregs between layers).
        h = _gelu_exact(
            jnp.dot(x_ref[...].astype(jnp.bfloat16), w0_ref[...],
                    preferred_element_type=jnp.float32) + b0_ref[...])
        # Remaining hidden layers; small static count -> unrolled.
        for l in range(n_extra_hidden):
            h = _gelu_exact(
                jnp.dot(h.astype(jnp.bfloat16), wh_ref[l],
                        preferred_element_type=jnp.float32) + bh_ref[l])
        # Dropout: eval-mode identity.

        if features:
            feat_ref = refs[idx]
            feat_ref[...] = h
        else:
            wo_ref = refs[idx]; bo_ref = refs[idx + 1]; out_ref = refs[idx + 2]
            out_ref[...] = (jnp.dot(h.astype(jnp.bfloat16), wo_ref[...],
                                    preferred_element_type=jnp.float32) + bo_ref[...])
    return kernel


def _fused_mlp_call(x, w0, b0, wh, bh, wo, bo, *, tile_b, features):
    B_p, F = x.shape
    H_p = w0.shape[1]
    n_extra = 0 if wh is None else wh.shape[0]
    grid = (B_p // tile_b,)

    in_arrays = [x, w0, b0]
    in_specs = [
        pl.BlockSpec((tile_b, F), lambda i: (i, 0)),      # batch-tiled input
        pl.BlockSpec((F, H_p), lambda i: (0, 0)),          # weights resident across steps
        pl.BlockSpec((1, H_p), lambda i: (0, 0)),
    ]
    if n_extra > 0:
        in_arrays += [wh, bh]
        in_specs += [
            pl.BlockSpec((n_extra, H_p, H_p), lambda i: (0, 0, 0)),
            pl.BlockSpec((n_extra, 1, H_p), lambda i: (0, 0, 0)),
        ]
    if features:
        out_shape = jax.ShapeDtypeStruct((B_p, H_p), jnp.float32)
        out_specs = pl.BlockSpec((tile_b, H_p), lambda i: (i, 0))
        out_lane = H_p
    else:
        N_p = wo.shape[1]
        in_arrays += [wo, bo]
        in_specs += [
            pl.BlockSpec((H_p, N_p), lambda i: (0, 0)),
            pl.BlockSpec((1, N_p), lambda i: (0, 0)),
        ]
        out_shape = jax.ShapeDtypeStruct((B_p, N_p), jnp.float32)
        out_specs = pl.BlockSpec((tile_b, N_p), lambda i: (i, 0))
        out_lane = N_p

    # VMEM budget from actual block sizes (conservatively assume double buffering
    # for every operand), clamped to [32 MiB, 100 MiB] so v5e/v6e aren't artificially
    # capped and v7x's 64 MiB isn't blindly exceeded at demo-scale shapes.
    resident_bytes = sum(int(a.size) * a.dtype.itemsize for a in in_arrays[1:])
    x_tile_bytes = tile_b * F * 4
    out_tile_bytes = tile_b * out_lane * 4
    need = 2 * (resident_bytes + x_tile_bytes + out_tile_bytes) + (4 << 20)
    vmem_limit = int(max(32 << 20, min(need, 100 << 20)))

    kernel = _make_mlp_kernel(n_extra, features)
    return pl.pallas_call(
        kernel,
        out_shape=out_shape,
        grid_spec=pltpu.PrefetchScalarGridSpec(
            num_scalar_prefetch=0,
            grid=grid,
            in_specs=in_specs,
            out_specs=out_specs,
        ),
        compiler_params=pltpu.CompilerParams(
            dimension_semantics=("parallel",),
            vmem_limit_bytes=vmem_limit),
    )(*in_arrays)


def init_base_dnn_params(key, in_dim, hidden_dim, output_dim, num_layers):
    """Deterministic params mirroring BaseDNN.__init__ layer shapes (PyTorch (out, in) convention)."""
    params = []
    dims = [in_dim] + [hidden_dim] * num_layers
    for li in range(num_layers):
        key, kw, kb = jax.random.split(key, 3)
        fan_in = dims[li]
        bound = 1.0 / jnp.sqrt(fan_in)
        w = jax.random.uniform(kw, (dims[li + 1], dims[li]), jnp.float32, -bound, bound)
        b = jax.random.uniform(kb, (dims[li + 1],), jnp.float32, -bound, bound)
        params.append((w, b))
    key, kw, kb = jax.random.split(key, 3)
    bound = 1.0 / jnp.sqrt(hidden_dim)
    w_out = jax.random.uniform(kw, (output_dim, hidden_dim), jnp.float32, -bound, bound)
    b_out = jax.random.uniform(kb, (output_dim,), jnp.float32, -bound, bound)
    return params, (w_out, b_out)


def prepare_fused_params(block_params, out_params, selected_features, full_in_dim):
    """One-time prep: transpose to (in, out), fold feature selection into layer 0,
    pad hidden/output widths to 128-lane multiples (input width left raw), cast weights to bf16."""
    hidden_dim = block_params[0][0].shape[0]
    output_dim = out_params[0].shape[0]
    n_layers = len(block_params)
    H_p = _round_up(hidden_dim, 128)
    N_p = _round_up(output_dim, 128)

    # Layer 0: scatter the selected-feature rows of W0^T into the raw input width so the
    # kernel consumes unselected inputs directly (no per-call activation gather).
    # NOTE: assumes unique selection indices (true for argsort top-k).
    w0_raw, b0_raw = block_params[0]
    w0 = jnp.zeros((full_in_dim, H_p), jnp.float32).at[selected_features, :hidden_dim].set(w0_raw.T)
    b0 = jnp.zeros((1, H_p), jnp.float32).at[0, :hidden_dim].set(b0_raw)

    if n_layers > 1:
        wh = jnp.zeros((n_layers - 1, H_p, H_p), jnp.float32)
        bh = jnp.zeros((n_layers - 1, 1, H_p), jnp.float32)
        for l in range(1, n_layers):
            w, b = block_params[l]
            wh = wh.at[l - 1, :hidden_dim, :hidden_dim].set(w.T)
            bh = bh.at[l - 1, 0, :hidden_dim].set(b)
        wh = wh.astype(jnp.bfloat16)
    else:
        wh, bh = None, None

    w_out, b_out = out_params
    wo = jnp.zeros((H_p, N_p), jnp.float32).at[:hidden_dim, :output_dim].set(w_out.T)
    bo = jnp.zeros((1, N_p), jnp.float32).at[0, :output_dim].set(b_out)

    return {"w0": w0.astype(jnp.bfloat16), "b0": b0, "wh": wh, "bh": bh,
            "wo": wo.astype(jnp.bfloat16), "bo": bo}


@functools.partial(jax.jit, static_argnames=("hidden_dim", "output_dim", "features"))
def base_dnn_forward(inputs, fused_params, *, hidden_dim, output_dim, features=False):
    B, _F = inputs.shape
    # Batch tile: full batch at demo size; 256-row tiles (MXU-friendly on v6e/v7x) when large.
    tile_b = min(_round_up(B, 8), 256)
    B_p = _round_up(B, tile_b)
    x = inputs
    if B_p != B:
        # Batch-only pad (feature dim is passed raw; W0 rows handle selection/width).
        x = jnp.zeros((B_p, inputs.shape[1]), inputs.dtype).at[:B].set(inputs)

    out = _fused_mlp_call(
        x, fused_params["w0"], fused_params["b0"],
        fused_params["wh"], fused_params["bh"],
        fused_params["wo"], fused_params["bo"],
        tile_b=tile_b, features=features)

    dim = hidden_dim if features else output_dim
    if out.shape[0] != B or out.shape[1] != dim:
        out = out[:B, :dim]
    return out


def _reference_forward(inputs, fused_params, hidden_dim, output_dim, features=False):
    """Pure-JAX reference using the same bf16-cast fused params (correctness check)."""
    w0, b0 = fused_params["w0"], fused_params["b0"]
    wh, bh = fused_params["wh"], fused_params["bh"]
    wo, bo = fused_params["wo"], fused_params["bo"]
    h = _gelu_exact(jnp.dot(inputs.astype(jnp.bfloat16), w0,
                            preferred_element_type=jnp.float32) + b0)
    n_extra = 0 if wh is None else wh.shape[0]
    for l in range(n_extra):
        h = _gelu_exact(jnp.dot(h.astype(jnp.bfloat16), wh[l],
                                preferred_element_type=jnp.float32) + bh[l])
    if features:
        return h[:, :hidden_dim]
    out = jnp.dot(h.astype(jnp.bfloat16), wo, preferred_element_type=jnp.float32) + bo
    return out[:, :output_dim]


if __name__ == "__main__":
    key = jax.random.PRNGKey(0)

    # Small, module-consistent shapes.
    batch = 8
    full_in_dim = 64        # raw feature dimension before selection
    n_selected = 32         # "top-k" selected features (stand-in for RF importances top-1000)
    hidden_dim = 32
    output_dim = 8
    num_layers = 2

    key, k_imp, k_x, k_p = jax.random.split(key, 4)
    # Deterministic stand-in for rf.feature_importances_ -> argsort descending -> top-k.
    importances = jax.random.uniform(k_imp, (full_in_dim,), jnp.float32)
    selected_features = jnp.argsort(importances)[::-1][:n_selected]

    inputs = jax.random.normal(k_x, (batch, full_in_dim), jnp.float32)
    block_params, out_params = init_base_dnn_params(
        k_p, n_selected, hidden_dim, output_dim, num_layers)

    fused_params = prepare_fused_params(block_params, out_params, selected_features, full_in_dim)

    # Default path: output head only (no hidden-feature HBM writeback).
    out = base_dnn_forward(inputs, fused_params,
                           hidden_dim=hidden_dim, output_dim=output_dim)
    out = jax.block_until_ready(out)
    assert out.shape == (batch, output_dim)
    ref_out = _reference_forward(inputs, fused_params, hidden_dim, output_dim)
    assert jnp.allclose(out, ref_out, rtol=2e-2, atol=2e-2), "kernel output mismatch vs reference"

    # features=True path: hidden features only (no output-head matmul).
    feats = base_dnn_forward(inputs, fused_params,
                             hidden_dim=hidden_dim, output_dim=output_dim, features=True)
    feats = jax.block_until_ready(feats)
    assert feats.shape == (batch, hidden_dim)
    ref_feats = _reference_forward(inputs, fused_params, hidden_dim, output_dim, features=True)
    assert jnp.allclose(feats, ref_feats, rtol=2e-2, atol=2e-2), "feature output mismatch vs reference"

    print("KERNEL_OK")
</pallas_src>

<mosaic_0001>
module attributes {stable_mosaic.version = 11 : i64} {
  func.func @kernel(%arg0: i32, %arg1: memref<8x64xf32, #tpu.memory_space<vmem>>, %arg2: memref<64x128xbf16, #tpu.memory_space<vmem>>, %arg3: memref<1x128xf32, #tpu.memory_space<vmem>>, %arg4: memref<1x128x128xbf16, #tpu.memory_space<vmem>>, %arg5: memref<1x1x128xf32, #tpu.memory_space<vmem>>, %arg6: memref<128x128xbf16, #tpu.memory_space<vmem>>, %arg7: memref<1x128xf32, #tpu.memory_space<vmem>>, %arg8: memref<8x128xf32, #tpu.memory_space<vmem>>) attributes {dimension_semantics = [#tpu.dimension_semantics<parallel>], iteration_bounds = array<i64: 1>, scalar_prefetch = 0 : i64, scratch_operands = 0 : i64, tpu.core_type = #tpu.core_type<tc>, window_params = [{transform_indices = @transform_0, window_bounds = array<i64: 8, 64>}, {pipeline_mode = #tpu.pipeline_mode<synchronous>, transform_indices = @transform_1, window_bounds = array<i64: 64, 128>}, {pipeline_mode = #tpu.pipeline_mode<synchronous>, transform_indices = @transform_2, window_bounds = array<i64: 1, 128>}, {pipeline_mode = #tpu.pipeline_mode<synchronous>, transform_indices = @transform_3, window_bounds = array<i64: 1, 128, 128>}, {pipeline_mode = #tpu.pipeline_mode<synchronous>, transform_indices = @transform_4, window_bounds = array<i64: 1, 1, 128>}, {pipeline_mode = #tpu.pipeline_mode<synchronous>, transform_indices = @transform_5, window_bounds = array<i64: 128, 128>}, {pipeline_mode = #tpu.pipeline_mode<synchronous>, transform_indices = @transform_6, window_bounds = array<i64: 1, 128>}, {transform_indices = @transform_7, window_bounds = array<i64: 8, 128>}]} {
    %c0 = arith.constant 0 : index
    %c0_0 = arith.constant 0 : index
    %0 = vector.load %arg1[%c0, %c0_0] : memref<8x64xf32, #tpu.memory_space<vmem>>, vector<8x64xf32>
    %1 = arith.truncf %0 : vector<8x64xf32> to vector<8x64xbf16>
    %c0_1 = arith.constant 0 : index
    %c0_2 = arith.constant 0 : index
    %2 = vector.load %arg2[%c0_1, %c0_2] : memref<64x128xbf16, #tpu.memory_space<vmem>>, vector<64x128xbf16>
    %cst = arith.constant dense<0.000000e+00> : vector<8x128xf32>
    %3 = tpu.matmul %1, %2, %cst {dimension_numbers = #tpu.dot_dimension_numbers<[1], [0], [0], [1], [0, 0, 1, 1], [], []>} : vector<8x64xbf16>, vector<64x128xbf16>, vector<8x128xf32> -> vector<8x128xf32>
    %c0_3 = arith.constant 0 : index
    %c0_4 = arith.constant 0 : index
    %4 = vector.load %arg3[%c0_3, %c0_4] : memref<1x128xf32, #tpu.memory_space<vmem>>, vector<1x128xf32>
    %5 = vector.broadcast %4 : vector<1x128xf32> to vector<8x128xf32>
    %6 = arith.addf %3, %5 : vector<8x128xf32>
    %cst_5 = arith.constant 5.000000e-01 : f32
    %7 = vector.broadcast %cst_5 : f32 to vector<8x128xf32>
    %8 = arith.mulf %7, %6 : vector<8x128xf32>
    %cst_6 = arith.constant 0.707106769 : f32
    %9 = vector.broadcast %cst_6 : f32 to vector<8x128xf32>
    %10 = arith.mulf %6, %9 : vector<8x128xf32>
    %11 = math.erf %10 : vector<8x128xf32>
    %cst_7 = arith.constant 1.000000e+00 : f32
    %12 = vector.broadcast %cst_7 : f32 to vector<8x128xf32>
    %13 = arith.addf %12, %11 : vector<8x128xf32>
    %14 = arith.mulf %8, %13 : vector<8x128xf32>
    %15 = arith.truncf %14 : vector<8x128xf32> to vector<8x128xbf16>
    %c0_8 = arith.constant 0 : index
    %c0_9 = arith.constant 0 : index
    %c0_10 = arith.constant 0 : index
    %16 = vector.load %arg4[%c0_8, %c0_9, %c0_10] : memref<1x128x128xbf16, #tpu.memory_space<vmem>>, vector<1x128x128xbf16>
    %17 = vector.shape_cast %16 : vector<1x128x128xbf16> to vector<128x128xbf16>
    %cst_11 = arith.constant dense<0.000000e+00> : vector<8x128xf32>
    %18 = tpu.matmul %15, %17, %cst_11 {dimension_numbers = #tpu.dot_dimension_numbers<[1], [0], [0], [1], [0, 0, 1, 1], [], []>} : vector<8x128xbf16>, vector<128x128xbf16>, vector<8x128xf32> -> vector<8x128xf32>
    %c0_12 = arith.constant 0 : index
    %c0_13 = arith.constant 0 : index
    %c0_14 = arith.constant 0 : index
    %19 = vector.load %arg5[%c0_12, %c0_13, %c0_14] : memref<1x1x128xf32, #tpu.memory_space<vmem>>, vector<1x1x128xf32>
    %20 = vector.shape_cast %19 : vector<1x1x128xf32> to vector<1x128xf32>
    %21 = vector.broadcast %20 : vector<1x128xf32> to vector<8x128xf32>
    %22 = arith.addf %18, %21 : vector<8x128xf32>
    %cst_15 = arith.constant 5.000000e-01 : f32
    %23 = vector.broadcast %cst_15 : f32 to vector<8x128xf32>
    %24 = arith.mulf %23, %22 : vector<8x128xf32>
    %cst_16 = arith.constant 0.707106769 : f32
    %25 = vector.broadcast %cst_16 : f32 to vector<8x128xf32>
    %26 = arith.mulf %22, %25 : vector<8x128xf32>
    %27 = math.erf %26 : vector<8x128xf32>
    %cst_17 = arith.constant 1.000000e+00 : f32
    %28 = vector.broadcast %cst_17 : f32 to vector<8x128xf32>
    %29 = arith.addf %28, %27 : vector<8x128xf32>
    %30 = arith.mulf %24, %29 : vector<8x128xf32>
    %31 = arith.truncf %30 : vector<8x128xf32> to vector<8x128xbf16>
    %c0_18 = arith.constant 0 : index
    %c0_19 = arith.constant 0 : index
    %32 = vector.load %arg6[%c0_18, %c0_19] : memref<128x128xbf16, #tpu.memory_space<vmem>>, vector<128x128xbf16>
    %cst_20 = arith.constant dense<0.000000e+00> : vector<8x128xf32>
    %33 = tpu.matmul %31, %32, %cst_20 {dimension_numbers = #tpu.dot_dimension_numbers<[1], [0], [0], [1], [0, 0, 1, 1], [], []>} : vector<8x128xbf16>, vector<128x128xbf16>, vector<8x128xf32> -> vector<8x128xf32>
    %c0_21 = arith.constant 0 : index
    %c0_22 = arith.constant 0 : index
    %34 = vector.load %arg7[%c0_21, %c0_22] : memref<1x128xf32, #tpu.memory_space<vmem>>, vector<1x128xf32>
    %35 = vector.broadcast %34 : vector<1x128xf32> to vector<8x128xf32>
    %36 = arith.addf %33, %35 : vector<8x128xf32>
    %c0_23 = arith.constant 0 : index
    %c0_24 = arith.constant 0 : index
    %37 = vector.load %arg8[%c0_23, %c0_24] : memref<8x128xf32, #tpu.memory_space<vmem>>, vector<8x128xf32>
    tpu.vector_store %arg8[%c0_23, %c0_24], %36 {strides = array<i32>} : memref<8x128xf32, #tpu.memory_space<vmem>>, vector<8x128xf32>,
    return
  }
  func.func @transform_0(%arg0: i32) -> (i32, i32) {
    %c0_i32 = arith.constant 0 : i32
    %c0_i32_0 = arith.constant 0 : i32
    return %arg0, %c0_i32 : i32, i32
  }
  func.func @transform_1(%arg0: i32) -> (i32, i32) {
    %c0_i32 = arith.constant 0 : i32
    %c0_i32_0 = arith.constant 0 : i32
    %c0_i32_1 = arith.constant 0 : i32
    return %c0_i32, %c0_i32_0 : i32, i32
  }
  func.func @transform_2(%arg0: i32) -> (i32, i32) {
    %c0_i32 = arith.constant 0 : i32
    %c0_i32_0 = arith.constant 0 : i32
    %c0_i32_1 = arith.constant 0 : i32
    return %c0_i32, %c0_i32_0 : i32, i32
  }
  func.func @transform_3(%arg0: i32) -> (i32, i32, i32) {
    %c0_i32 = arith.constant 0 : i32
    %c0_i32_0 = arith.constant 0 : i32
    %c0_i32_1 = arith.constant 0 : i32
    %c0_i32_2 = arith.constant 0 : i32
    return %c0_i32, %c0_i32_0, %c0_i32_1 : i32, i32, i32
  }
  func.func @transform_4(%arg0: i32) -> (i32, i32, i32) {
    %c0_i32 = arith.constant 0 : i32
    %c0_i32_0 = arith.constant 0 : i32
    %c0_i32_1 = arith.constant 0 : i32
    %c0_i32_2 = arith.constant 0 : i32
    return %c0_i32, %c0_i32_0, %c0_i32_1 : i32, i32, i32
  }
  func.func @transform_5(%arg0: i32) -> (i32, i32) {
    %c0_i32 = arith.constant 0 : i32
    %c0_i32_0 = arith.constant 0 : i32
    %c0_i32_1 = arith.constant 0 : i32
    return %c0_i32, %c0_i32_0 : i32, i32
  }
  func.func @transform_6(%arg0: i32) -> (i32, i32) {
    %c0_i32 = arith.constant 0 : i32
    %c0_i32_0 = arith.constant 0 : i32
    %c0_i32_1 = arith.constant 0 : i32
    return %c0_i32, %c0_i32_0 : i32, i32
  }
  func.func @transform_7(%arg0: i32) -> (i32, i32) {
    %c0_i32 = arith.constant 0 : i32
    %c0_i32_0 = arith.constant 0 : i32
    return %arg0, %c0_i32 : i32, i32
  }
}

</mosaic_0001>

<bundles_post_ra>
// kernel: base_dnn_forward.1
= control target key start
LH: loop header
LB: loop body
LE: loop exit
PB: predicated region body
PF: predicated region fallthrough
CT: control target
= control target key end

     0   :  { %12 = vsyncpa [#allocation3], 0  ;;  %s766_s0 = inlined_call_operand.hbm [shape: f32[8,64], index: 0, kind: input, shape index: {}]   ;;  %s767_s1 = inlined_call_operand.hbm [shape: bf16[64,128], index: 1, kind: input, shape index: {}]   ;;  %s768_s2 = inlined_call_operand.vmem [shape: f32[1,128], index: 2, kind: input, shape index: {}]   ;;  %s769_s3 = inlined_call_operand.hbm [shape: bf16[1,128,128], index: 3, kind: input, shape index: {}]   ;;  %s770_s4 = inlined_call_operand.vmem [shape: f32[1,1,128], index: 4, kind: input, shape index: {}]   ;;  %s771_s5 = inlined_call_operand.hbm [shape: bf16[128,128], index: 5, kind: input, shape index: {}]   ;;  %s772_s6 = inlined_call_operand.vmem [shape: f32[1,128], index: 6, kind: input, shape index: {}]   ;;  %s773_s7 = inlined_call_operand.hbm [shape: f32[8,128], index: 7, kind: output, shape index: {}]  }
   0x1   :  { %13 = vsyncpa [#allocation6], 0 }
   0x2   :  { %14 = vsyncpa [#allocation9], 0 }
   0x3   :  { %15 = vsyncpa [#allocation4], 0  ;;  %s658_s24 = smov [#allocation5]  }
   0x4   :  { %s31_s25 = sshll.u32 %s658_s24, 4  ;;  %s32_s25 = int_to_ptr.vmem [resolvable:$true] %s31_s25 }
   0x5   :  { %s558_s26 = scalar_lea.vmem %s32_s25, 512  ;;  %p563_p1 = scmp.lt.s32.totalorder %s32_s25, %s32_s25 }
   0x6   :  { %p559_p0 = scmp.ne.s32.totalorder %s32_s25, %s558_s26  ;;  %p564_p2 = scmp.lt.s32.totalorder %s558_s26, %s558_s26 }
   0x8   :  { %p565_p3 = por %p564_p2, %p563_p1 }
   0xa   :  { %p566_p4 = pnand %p565_p3, %p559_p0 }
   0xc   :  { %569 = shalt.err (!%p566_p4)
}
   0xd   :  { %s659_s27 = smov 64   ;;  %s660_s28 = smov 4  }
   0xe   :  { %37 = dma.hbm_to_vmem [thread:$0]  %s767_s1, 512, %s32_s25, [#allocation6], %s659_s27, %s659_s27, %s660_s28  }
   0xf   :  { %s661_s8 = smov [#allocation2]   ;;  %s662_s10 = smov [#allocation7]  }
  0x10   :  { %s22_s9 = sshll.u32 %s661_s8, 4  ;;  %s45_s11 = sshll.u32 %s662_s10, 4  ;;  %s23_s9 = int_to_ptr.vmem [resolvable:$true] %s22_s9  ;;  %s46_s11 = int_to_ptr.vmem [resolvable:$true] %s45_s11 }
  0x11   :  { %s578_s12 = scalar_lea.vmem %s23_s9, 128  ;;  %p583_p6 = scmp.lt.s32.totalorder %s23_s9, %s23_s9 }
  0x12   :  { %p579_p5 = scmp.ne.s32.totalorder %s23_s9, %s578_s12  ;;  %p584_p7 = scmp.lt.s32.totalorder %s578_s12, %s578_s12 }
  0x14   :  { %p585_p8 = por %p584_p7, %p583_p6 }
  0x16   :  { %p586_p9 = pnand %p585_p8, %p579_p5 }
  0x18   :  { %589 = shalt.err (!%p586_p9)
}
  0x19   :  { %25 = dma.hbm_to_vmem [thread:$0]  %s766_s0, 128, %s23_s9, [#allocation3]  }
  0x1a   :  { %s598_s15 = scalar_lea.vmem %s46_s11, 1024  ;;  %p603_p11 = scmp.lt.s32.totalorder %s46_s11, %s46_s11 }
  0x1b   :  { %p599_p10 = scmp.ne.s32.totalorder %s46_s11, %s598_s15  ;;  %p604_p12 = scmp.lt.s32.totalorder %s598_s15, %s598_s15 }
  0x1d   :  { %p605_p13 = por %p604_p12, %p603_p11 }
  0x1f   :  { %p606_p0 = pnand %p605_p13, %p599_p10 }
  0x21   :  { %609 = shalt.err (!%p606_p0)
}
  0x22   :  { %51 = dma.hbm_to_vmem [thread:$0]  %s769_s3, 1024, %s46_s11, [#allocation6], %s659_s27, %s659_s27, %s660_s28  }
  0x23   :  { %s663_s17 = smov [#allocation8]  }
  0x24   :  { %s59_s18 = sshll.u32 %s663_s17, 4  ;;  %s60_s18 = int_to_ptr.vmem [resolvable:$true] %s59_s18 }
  0x25   :  { %s618_s19 = scalar_lea.vmem %s60_s18, 1024  ;;  %p623_p2 = scmp.lt.s32.totalorder %s60_s18, %s60_s18 }
  0x26   :  { %p619_p1 = scmp.ne.s32.totalorder %s60_s18, %s618_s19  ;;  %p624_p3 = scmp.lt.s32.totalorder %s618_s19, %s618_s19 }
  0x28   :  { %p625_p4 = por %p624_p3, %p623_p2 }
  0x2a   :  { %p626_p5 = pnand %p625_p4, %p619_p1 }
  0x2c   :  { %629 = shalt.err (!%p626_p5)
}
  0x2d   :  { %65 = dma.hbm_to_vmem [thread:$0]  %s771_s5, 1024, %s60_s18, [#allocation9], %s659_s27, %s659_s27, %s660_s28  }
  0x2e   :  { %650 = dma.done.wait [#allocation3], 128  }
  0x2f   :  { %651 = vsyncadd [#allocation3], 4294967168 }
  0x30   :  { %652 = dma.done.wait [#allocation6], 1536  }
  0x31   :  { %653 = vsyncadd [#allocation6], 4294965760 }
  0x32   :  { %654 = dma.done.wait [#allocation9], 1024  }
  0x33   :  { %655 = vsyncadd [#allocation9], 4294966272  ;;  %v664_v0 = vmov 0.0   ;;  %vm665_vm0 = vmmov 0   ;;  %v526_v1 = vld [vmem:[#allocation5 + $0x18] sm:$0xff]   ;;  %v527_v2 = vld [vmem:[#allocation5 + $0x10] sm:$0xff]  }
  0x34   :  { %465 = vmatprep.subr.bf16.mxu0 %v664_v0  ;;  %473 = vmatprep.mubr.msk.bf16.mxu0 %vm665_vm0, %v664_v0  ;;  %v530_v3 = vld [vmem:[#allocation7 + $0x38] sm:$0xff]   ;;  %v528_v4 = vld [vmem:[#allocation5 + $0x8] sm:$0xff]   ;;  %vm122_vm1 = vcmask 523264   ;;  %v531_v5 = vld [vmem:[#allocation7 + $0x30] sm:$0xff]   ;;  %s666_s24 = smov [#allocation10]  }
  0x35   :  { %477 = vmatprep.subr.bf16.mxu1 %v664_v0  ;;  %493 = vmatprep.mubr.msk.bf16.mxu1 %vm665_vm0, %v664_v0  ;;  %v529_v6 = vld [vmem:[#allocation5] sm:$0xff]   ;;  %v81_v7 = vld [vmem:[#allocation2] sm:$0xff]  ;;  %v532_v9 = vld [vmem:[#allocation7 + $0x28] sm:$0xff]   ;;  %s407_s25 = sshll.u32 %s666_s24, 4  ;;  %s408_s25 = int_to_ptr.vmem [resolvable:$true] %s407_s25 }
  0x36   :  { %466 = vmatpush3.bf16.msra.mxu0 %v526_v1  ;;  %478 = vmatpush3.bf16.msra.mxu1 %v530_v3  ;;  %v82_v8 = vpack.c.bf16 %v81_v7, %v81_v7  ;;  %v533_v10 = vld [vmem:[#allocation7 + $0x20] sm:$0xff]   ;;  %v534_v11 = vld [vmem:[#allocation7 + $0x18] sm:$0xff]   ;;  %v535_v12 = vld [vmem:[#allocation7 + $0x10] sm:$0xff]   ;;  %p635_p7 = scmp.lt.s32.totalorder %s408_s25, %s408_s25 }
  0x37   :  { %467 = vmatprep.subr.bf16.mxu0 %v664_v0  ;;  %479 = vmatprep.subr.bf16.mxu1 %v664_v0  ;;  %v536_v13 = vld [vmem:[#allocation7 + $0x8] sm:$0xff]   ;;  %v537_v14 = vld [vmem:[#allocation7] sm:$0xff]   ;;  %v538_v15 = vld [vmem:[#allocation8 + $0x38] sm:$0xff]  }
  0x38   :  { %v539_v16 = vld [vmem:[#allocation8 + $0x30] sm:$0xff]   ;;  %v418_v17 = vld [vmem:[%s768_s2] ss:$0 sm:$0xff]  ;;  %v540_v29 = vld [vmem:[#allocation8 + $0x28] sm:$0xff]  }
  0x39   :  { %v541_v30 = vld [vmem:[#allocation8 + $0x20] sm:$0xff]   ;;  %v542_v31 = vld [vmem:[#allocation8 + $0x18] sm:$0xff]   ;;  %v543_v32 = vld [vmem:[#allocation8 + $0x10] sm:$0xff]  }
  0x3a   :  { %468 = vmatpush3.bf16.msra.mxu0 %v527_v2  ;;  %480 = vmatpush3.bf16.msra.mxu1 %v531_v5  ;;  %v544_v33 = vld [vmem:[#allocation8 + $0x8] sm:$0xff]   ;;  %v545_v34 = vld [vmem:[#allocation8] sm:$0xff]   ;;  %v424_v35 = vld [vmem:[%s770_s4] ss:$0 sm:$0xff]  ;;  %s630_s4 = scalar_lea.vmem %s408_s25, 128 }
  0x3b   :  { %469 = vmatprep.subr.bf16.mxu0 %v664_v0  ;;  %481 = vmatprep.subr.bf16.mxu1 %v664_v0  ;;  %v433_v47 = vld [vmem:[%s772_s6] ss:$0 sm:$0xff]  ;;  %p631_p6 = scmp.ne.s32.totalorder %s408_s25, %s630_s4  ;;  %p636_p8 = scmp.lt.s32.totalorder %s630_s4, %s630_s4 }
  0x3d   :  { %p637_p9 = por %p636_p8, %p635_p7 }
  0x3e   :  { %470 = vmatpush3.bf16.msra.mxu0 %v528_v4  ;;  %482 = vmatpush3.bf16.msra.mxu1 %v532_v9 }
  0x3f   :  { %471 = vmatprep.subr.bf16.mxu0 %v664_v0  ;;  %483 = vmatprep.subr.bf16.mxu1 %v664_v0  ;;  %p638_p10 = pnand %p637_p9, %p631_p6 }
  0x42   :  { %472 = vmatpush3.bf16.msra.mxu0 %v529_v6  ;;  %484 = vmatpush3.bf16.msra.mxu1 %v533_v10 }
  0x43   :  { %497 = vmatprep.subr.bf16.mxu0 %v664_v0  ;;  %485 = vmatprep.subr.bf16.mxu1 %v664_v0 }
  0x45   :  { %474 = vmatmul.mubr.msk.bf16.vlgmr.msra.gmra.mxu0 %vm122_vm1, %v82_v8 }
  0x46   :  { %513 = vmatprep.mubr.msk.bf16.mxu0 %vm665_vm0, %v664_v0  ;;  %486 = vmatpush3.bf16.msra.mxu1 %v534_v11 }
  0x47   :  { %487 = vmatprep.subr.bf16.mxu1 %v664_v0  ;;  %498 = vmatpush3.bf16.msra.mxu0 %v538_v15 }
  0x48   :  { %499 = vmatprep.subr.bf16.mxu0 %v664_v0 }
  0x4a   :  { %488 = vmatpush3.bf16.msra.mxu1 %v535_v12 }
  0x4b   :  { %489 = vmatprep.subr.bf16.mxu1 %v664_v0  ;;  %500 = vmatpush3.bf16.msra.mxu0 %v539_v16 }
  0x4c   :  { %501 = vmatprep.subr.bf16.mxu0 %v664_v0 }
  0x4e   :  { %490 = vmatpush3.bf16.msra.mxu1 %v536_v13 }
  0x4f   :  { %491 = vmatprep.subr.bf16.mxu1 %v664_v0  ;;  %502 = vmatpush3.bf16.msra.mxu0 %v540_v29 }
  0x50   :  { %503 = vmatprep.subr.bf16.mxu0 %v664_v0 }
  0x52   :  { %492 = vmatpush3.bf16.msra.mxu1 %v537_v14 }
  0x53   :  { %504 = vmatpush3.bf16.msra.mxu0 %v541_v30 }
  0x54   :  { %505 = vmatprep.subr.bf16.mxu0 %v664_v0 }
  0x57   :  { %506 = vmatpush3.bf16.msra.mxu0 %v542_v31 }
  0x58   :  { %507 = vmatprep.subr.bf16.mxu0 %v664_v0 }
  0x5b   :  { %508 = vmatpush3.bf16.msra.mxu0 %v543_v32 }
  0x5c   :  { %509 = vmatprep.subr.bf16.mxu0 %v664_v0 }
  0x5f   :  { %510 = vmatpush3.bf16.msra.mxu0 %v544_v33 }
  0x60   :  { %511 = vmatprep.subr.bf16.mxu0 %v664_v0 }
  0x63   :  { %512 = vmatpush3.bf16.msra.mxu0 %v545_v34 }
 0x105   :  { %v160_v18 = vpop.f32.mrf.mxu0 }
 0x106   :  { %v161_v19 = vadd.f32 %v418_v17, %v160_v18 }
 0x107   :  { %v475_v20 = vpop.f32.mrf.mxu0 }
 0x108   :  { %v167_v21 = vmul.f32 0.70710677, %v161_v19  ;;  %v166_v25 = vmul.f32 0.5, %v161_v19 }
 0x109   :  { %v163_v22 = vpop.f32.mrf.mxu0 }
 0x10a   :  { %546 = verf.f32 %v167_v21 }
 0x10b   :  { %v476_v23 = vpop.f32.mrf.mxu0 }
 0x117   :  { %v547_v24 = vpop.eup %546 }
 0x118   :  { %v169_v26 = vadd.f32 1.0, %v547_v24 }
 0x11a   :  { %v170_v27 = vmul.f32 %v169_v26, %v166_v25 }
 0x11c   :  { %v171_v28 = vpack.c.bf16 %v170_v27, %v170_v27 }
 0x11e   :  { %494 = vmatmul.mubr.bf16.vlgmr.msra.gmra.mxu1 %v171_v28 }
 0x1de   :  { %v277_v36 = vpop.f32.mrf.mxu1 }
 0x1df   :  { %v278_v37 = vadd.f32 %v424_v35, %v277_v36 }
 0x1e0   :  { %v495_v38 = vpop.f32.mrf.mxu1 }
 0x1e1   :  { %v284_v39 = vmul.f32 0.70710677, %v278_v37  ;;  %v283_v43 = vmul.f32 0.5, %v278_v37 }
 0x1e2   :  { %v280_v40 = vpop.f32.mrf.mxu1 }
 0x1e3   :  { %548 = verf.f32 %v284_v39 }
 0x1e4   :  { %v496_v41 = vpop.f32.mrf.mxu1 }
 0x1f0   :  { %v549_v42 = vpop.eup %548 }
 0x1f1   :  { %v286_v44 = vadd.f32 1.0, %v549_v42 }
 0x1f3   :  { %v287_v45 = vmul.f32 %v286_v44, %v283_v43 }
 0x1f5   :  { %v288_v46 = vpack.c.bf16 %v287_v45, %v287_v45 }
 0x1f7   :  { %514 = vmatmul.mubr.bf16.vlgmr.msra.gmra.mxu0 %v288_v46 }
 0x2b7   :  { %v394_v48 = vpop.f32.mrf.mxu0 }
 0x2b8   :  { %v395_v49 = vadd.f32 %v433_v47, %v394_v48 }
 0x2b9   :  { %v515_v50 = vpop.f32.mrf.mxu0 }
 0x2ba   :  { %400 = vst [vmem:[#allocation10] sm:$0xff] %v395_v49 }
 0x2bb   :  { %v397_v51 = vpop.f32.mrf.mxu0 }
 0x2bc   :  { %641 = shalt.err (!%p638_p10)
}
 0x2bd   :  { %410 = dma.vmem_to_hbm [thread:$0]  %s408_s25, 128, %s773_s7, [#allocation4]   ;;  %v516_v52 = vpop.f32.mrf.mxu0 }
 0x2be   :  { %656 = dma.done.wait [#allocation4], 128  }
 0x2bf   :  { %657 = vsyncadd [#allocation4], 4294967168 }
 0x2c0   :  { %414 = vsyncpa [#allocation3], 1 }
 0x2c1   :  { %415 = vsyncpa [#allocation6], 1 }
 0x2c2   :  { %416 = vsyncpa [#allocation9], 1 }
 0x2c3   :  { %417 = vsyncpa [#allocation4], 1 }

</bundles_post_ra>
